<compile_context>
chip_gen: v5e
topology: v5e:2x2
jax: 0.10.0
libtpu: 0.0.40
codegen_flags: <defaults>
</compile_context>

<pallas_src>
import jax
import jax.numpy as jnp
from jax import lax
from jax.experimental import pallas as pl
from jax.experimental.pallas import tpu as pltpu


def _inner_product_decoder_kernel(zi_ref, zj_ref, adj_ref):
    # zi_ref: (TM, D) row-tile of z, zj_ref: (TN, D) row-tile of z.
    # NT contraction on the shared D axis (no in-kernel .T / relayout);
    # MXU takes the native (f32 or bf16) operands directly, accumulates in f32.
    logits = lax.dot_general(
        zi_ref[...], zj_ref[...],
        dimension_numbers=(((1,), (1,)), ((), ())),
        preferred_element_type=jnp.float32)
    # sigmoid runs on VPU/EUP; cast to the requested output dtype on store.
    adj_ref[...] = jax.nn.sigmoid(logits).astype(adj_ref.dtype)


def _fit_tile(t, n, align):
    """Full extent if the tile covers the axis, else round down to `align`."""
    if t >= n:
        return n
    return max(align, (t // align) * align)


def inner_product_decoder(z, *, dropout=0.0, training=False, key=None,
                          tm=512, tn=512, out_dtype=None):
    """adj = sigmoid(dropout(z) @ dropout(z).T)   (dropout only if training).

    out_dtype: override output dtype (e.g. jnp.bfloat16 to halve the dominant
    N*N HBM write traffic); defaults to z.dtype to match the PyTorch module.
    """
    if training and dropout > 0.0:
        # glue: the same dropped z feeds both sides of the inner product.
        keep = jax.random.bernoulli(key, 1.0 - dropout, z.shape)
        z = jnp.where(keep, z / (1.0 - dropout), 0.0).astype(z.dtype)

    N, D = z.shape
    out_dtype = z.dtype if out_dtype is None else jnp.dtype(out_dtype)

    # The N x N output write dominates HBM traffic; pick big, lane-dense tiles
    # while respecting the (8, 128) block constraint (full extent is always ok).
    tm = _fit_tile(tm, N, 8)     # sublane-aligned row tile
    tn = _fit_tile(tn, N, 128)   # lane-aligned column tile (unmasked vst)
    grid = (pl.cdiv(N, tm), pl.cdiv(N, tn))

    out_isz = jnp.dtype(out_dtype).itemsize
    in_isz = jnp.dtype(z.dtype).itemsize

    # VMEM budget: double-buffered output tile + two double-buffered row tiles.
    vmem_needed = 2 * (tm * tn * out_isz + (tm + tn) * D * in_isz)
    compiler_kwargs = dict(dimension_semantics=("parallel", "parallel"))
    if vmem_needed > (24 << 20):
        # Only raise the scoped-VMEM limit when very large tiles need it;
        # cap well below v7x's 64 MiB/TC to leave compiler-scratch headroom.
        compiler_kwargs["vmem_limit_bytes"] = min(vmem_needed + (8 << 20),
                                                  56 << 20)

    cost = pl.CostEstimate(
        flops=2 * N * N * D,
        transcendentals=N * N,  # one sigmoid per edge
        bytes_accessed=N * N * out_isz + 2 * N * D * in_isz)

    return pl.pallas_call(
        _inner_product_decoder_kernel,
        out_shape=jax.ShapeDtypeStruct((N, N), out_dtype),
        grid_spec=pltpu.PrefetchScalarGridSpec(
            num_scalar_prefetch=0,
            grid=grid,
            in_specs=[
                pl.BlockSpec((tm, D), lambda i, j: (i, 0)),  # row tile i of z
                pl.BlockSpec((tn, D), lambda i, j: (j, 0)),  # row tile j of z
            ],
            out_specs=pl.BlockSpec((tm, tn), lambda i, j: (i, j)),
        ),
        compiler_params=pltpu.CompilerParams(**compiler_kwargs),
        cost_estimate=cost,
    )(z, z)


if __name__ == "__main__":
    # Small deterministic example: N=128 nodes, D=32 latent dims.
    key = jax.random.PRNGKey(0)
    N, D = 128, 32
    z = jax.random.normal(key, (N, D), dtype=jnp.float32)

    adj = inner_product_decoder(z, dropout=0.5, training=False)
    adj = jax.block_until_ready(adj)

    # Reference check (eval mode: dropout is identity).
    ref = jax.nn.sigmoid(z @ z.T)
    assert adj.shape == (N, N)
    assert jnp.allclose(adj, ref, atol=1e-5, rtol=1e-5), "mismatch vs reference"

    # Optional bf16 adjacency output (halves the dominant N*N write traffic);
    # looser tolerance since edge probabilities are stored in bf16.
    adj_bf16 = jax.block_until_ready(
        inner_product_decoder(z, out_dtype=jnp.bfloat16))
    assert adj_bf16.dtype == jnp.bfloat16
    assert jnp.allclose(adj_bf16.astype(jnp.float32), ref, atol=1e-2), \
        "bf16 output mismatch vs reference"

    print("KERNEL_OK")
</pallas_src>

<mosaic_0001>
module attributes {stable_mosaic.version = 11 : i64} {
  func.func @_inner_product_decoder_kernel(%arg0: i32, %arg1: i32, %arg2: memref<128x32xf32, #tpu.memory_space<vmem>>, %arg3: memref<128x32xf32, #tpu.memory_space<vmem>>, %arg4: memref<128x128xf32, #tpu.memory_space<vmem>>) attributes {dimension_semantics = [#tpu.dimension_semantics<parallel>, #tpu.dimension_semantics<parallel>], iteration_bounds = array<i64: 1, 1>, scalar_prefetch = 0 : i64, scratch_operands = 0 : i64, tpu.core_type = #tpu.core_type<tc>, window_params = [{transform_indices = @transform_0, window_bounds = array<i64: 128, 32>}, {transform_indices = @transform_1, window_bounds = array<i64: 128, 32>}, {transform_indices = @transform_2, window_bounds = array<i64: 128, 128>}]} {
    %c0 = arith.constant 0 : index
    %c0_0 = arith.constant 0 : index
    %0 = vector.load %arg2[%c0, %c0_0] : memref<128x32xf32, #tpu.memory_space<vmem>>, vector<128x32xf32>
    %c0_1 = arith.constant 0 : index
    %c0_2 = arith.constant 0 : index
    %1 = vector.load %arg3[%c0_1, %c0_2] : memref<128x32xf32, #tpu.memory_space<vmem>>, vector<128x32xf32>
    %cst = arith.constant dense<0.000000e+00> : vector<128x128xf32>
    %2 = tpu.matmul %0, %1, %cst {dimension_numbers = #tpu.dot_dimension_numbers<[1], [1], [0], [0], [0, 0, 1, 0], [], []>} : vector<128x32xf32>, vector<128x32xf32>, vector<128x128xf32> -> vector<128x128xf32>
    %3 = arith.negf %2 : vector<128x128xf32>
    %4 = math.exp %3 : vector<128x128xf32>
    %cst_3 = arith.constant 1.000000e+00 : f32
    %5 = vector.broadcast %cst_3 : f32 to vector<128x128xf32>
    %6 = arith.addf %5, %4 : vector<128x128xf32>
    %7 = arith.divf %5, %6 : vector<128x128xf32>
    %c0_4 = arith.constant 0 : index
    %c0_5 = arith.constant 0 : index
    %8 = vector.load %arg4[%c0_4, %c0_5] : memref<128x128xf32, #tpu.memory_space<vmem>>, vector<128x128xf32>
    tpu.vector_store %arg4[%c0_4, %c0_5], %7 {strides = array<i32>} : memref<128x128xf32, #tpu.memory_space<vmem>>, vector<128x128xf32>,
    return
  }
  func.func @transform_0(%arg0: i32, %arg1: i32) -> (i32, i32) {
    %c0_i32 = arith.constant 0 : i32
    %c0_i32_0 = arith.constant 0 : i32
    return %arg0, %c0_i32 : i32, i32
  }
  func.func @transform_1(%arg0: i32, %arg1: i32) -> (i32, i32) {
    %c0_i32 = arith.constant 0 : i32
    %c0_i32_0 = arith.constant 0 : i32
    return %arg1, %c0_i32 : i32, i32
  }
  func.func @transform_2(%arg0: i32, %arg1: i32) -> (i32, i32) {
    %c0_i32 = arith.constant 0 : i32
    return %arg0, %arg1 : i32, i32
  }
}

</mosaic_0001>

<bundles_post_ra>
// kernel: tpu_custom_call.1
= control target key start
LH: loop header
LB: loop body
LE: loop exit
PB: predicated region body
PF: predicated region fallthrough
CT: control target
= control target key end

     0   :  { %vm44_vm0 = vcmask 261120   ;;  %s1104_s0 = inlined_call_operand.vmem [shape: f32[128,32], index: 0, kind: input, shape index: {}]   ;;  %s1105_s1 = inlined_call_operand.vmem [shape: f32[128,32], index: 1, kind: input, shape index: {}]   ;;  %s1106_s2 = inlined_call_operand.hbm [shape: f32[128,128], index: 2, kind: output, shape index: {}]  }
   0x1   :  { %v43_v0 = vld [vmem:[%s1105_s1 + $0x78] sm:$0xff]  ;;  %v42_v1 = vld [vmem:[%s1105_s1 + $0x70] sm:$0xff] }
   0x2   :  { %544 = vmatpush.xpose.msk.msra.mxu0 %vm44_vm0, %v43_v0  ;;  %592 = vmatpush.xpose.msk.msra.mxu1 %vm44_vm0, %v43_v0 }
   0x3   :  { %593 = vmatpush.xpose.msk.msra.mxu2 %vm44_vm0, %v43_v0  ;;  %594 = vmatpush.xpose.msk.msra.mxu3 %vm44_vm0, %v43_v0 }
   0x4   :  { %7 = vsyncpa [#allocation3], 0  ;;  %v41_v2 = vld [vmem:[%s1105_s1 + $0x68] sm:$0xff]  ;;  %v40_v3 = vld [vmem:[%s1105_s1 + $0x60] sm:$0xff]  ;;  %s734_s19 = smov 128   ;;  %s735_s20 = smov 8  }
   0x5   :  { %v39_v4 = vld [vmem:[%s1105_s1 + $0x58] sm:$0xff]  ;;  %v38_v5 = vld [vmem:[%s1105_s1 + $0x50] sm:$0xff]  ;;  %v37_v6 = vld [vmem:[%s1105_s1 + $0x48] sm:$0xff] }
   0x6   :  { %545 = vmatpush.xpose.msk.msra.mxu0 %vm44_vm0, %v42_v1  ;;  %595 = vmatpush.xpose.msk.msra.mxu1 %vm44_vm0, %v42_v1  ;;  %v36_v7 = vld [vmem:[%s1105_s1 + $0x40] sm:$0xff]  ;;  %v35_v8 = vld [vmem:[%s1105_s1 + $0x38] sm:$0xff]  ;;  %v34_v9 = vld [vmem:[%s1105_s1 + $0x30] sm:$0xff] }
   0x7   :  { %596 = vmatpush.xpose.msk.msra.mxu2 %vm44_vm0, %v42_v1  ;;  %597 = vmatpush.xpose.msk.msra.mxu3 %vm44_vm0, %v42_v1  ;;  %v33_v10 = vld [vmem:[%s1105_s1 + $0x28] sm:$0xff]  ;;  %v32_v11 = vld [vmem:[%s1105_s1 + $0x20] sm:$0xff]  ;;  %v31_v12 = vld [vmem:[%s1105_s1 + $0x18] sm:$0xff] }
   0x8   :  { %v30_v13 = vld [vmem:[%s1105_s1 + $0x10] sm:$0xff]  ;;  %v29_v14 = vld [vmem:[%s1105_s1 + $0x8] sm:$0xff]  ;;  %v28_v15 = vld [vmem:[%s1105_s1] sm:$0xff]  ;;  %s532_s1 = sshll.u32 %s1106_s2, 4  ;;  %s533_s1 = int_to_ptr.hbm [resolvable:$true] %s532_s1 }
   0x9   :  { %v12_v16 = vld [vmem:[%s1104_s0] sm:$0xff]  ;;  %v13_v20 = vld [vmem:[%s1104_s0 + $0x8] sm:$0xff]  ;;  %v14_v24 = vld [vmem:[%s1104_s0 + $0x10] sm:$0xff] }
   0xa   :  { %546 = vmatpush.xpose.msk.msra.mxu0 %vm44_vm0, %v41_v2  ;;  %598 = vmatpush.xpose.msk.msra.mxu1 %vm44_vm0, %v41_v2  ;;  %v16_v17 = vld [vmem:[%s1104_s0 + $0x20] sm:$0xff]  ;;  %v17_v21 = vld [vmem:[%s1104_s0 + $0x28] sm:$0xff]  ;;  %v18_v25 = vld [vmem:[%s1104_s0 + $0x30] sm:$0xff] }
   0xb   :  { %599 = vmatpush.xpose.msk.msra.mxu2 %vm44_vm0, %v41_v2  ;;  %600 = vmatpush.xpose.msk.msra.mxu3 %vm44_vm0, %v41_v2  ;;  %v20_v18 = vld [vmem:[%s1104_s0 + $0x40] sm:$0xff]  ;;  %v21_v22 = vld [vmem:[%s1104_s0 + $0x48] sm:$0xff]  ;;  %v22_v26 = vld [vmem:[%s1104_s0 + $0x50] sm:$0xff] }
   0xc   :  { %v24_v19 = vld [vmem:[%s1104_s0 + $0x60] sm:$0xff]  ;;  %v25_v23 = vld [vmem:[%s1104_s0 + $0x68] sm:$0xff]  ;;  %v26_v27 = vld [vmem:[%s1104_s0 + $0x70] sm:$0xff] }
   0xd   :  { %v15_v28 = vld [vmem:[%s1104_s0 + $0x18] sm:$0xff] }
   0xe   :  { %547 = vmatpush.xpose.msk.msra.mxu0 %vm44_vm0, %v40_v3  ;;  %601 = vmatpush.xpose.msk.msra.mxu1 %vm44_vm0, %v40_v3  ;;  %v19_v29 = vld [vmem:[%s1104_s0 + $0x38] sm:$0xff] }
   0xf   :  { %602 = vmatpush.xpose.msk.msra.mxu2 %vm44_vm0, %v40_v3  ;;  %603 = vmatpush.xpose.msk.msra.mxu3 %vm44_vm0, %v40_v3  ;;  %v23_v30 = vld [vmem:[%s1104_s0 + $0x58] sm:$0xff] }
  0x10   :  { %v27_v31 = vld [vmem:[%s1104_s0 + $0x78] sm:$0xff]  ;;  %s733_s0 = smov [#allocation2]  }
  0x11   :  { %s530_s16 = sshll.u32 %s733_s0, 4  ;;  %s531_s16 = int_to_ptr.vmem [resolvable:$true] %s530_s16 }
  0x12   :  { %548 = vmatpush.xpose.msk.msra.mxu0 %vm44_vm0, %v39_v4  ;;  %604 = vmatpush.xpose.msk.msra.mxu1 %vm44_vm0, %v39_v4 }
  0x13   :  { %605 = vmatpush.xpose.msk.msra.mxu2 %vm44_vm0, %v39_v4  ;;  %606 = vmatpush.xpose.msk.msra.mxu3 %vm44_vm0, %v39_v4 }
  0x16   :  { %549 = vmatpush.xpose.msk.msra.mxu0 %vm44_vm0, %v38_v5  ;;  %607 = vmatpush.xpose.msk.msra.mxu1 %vm44_vm0, %v38_v5 }
  0x17   :  { %608 = vmatpush.xpose.msk.msra.mxu2 %vm44_vm0, %v38_v5  ;;  %609 = vmatpush.xpose.msk.msra.mxu3 %vm44_vm0, %v38_v5 }
  0x1a   :  { %550 = vmatpush.xpose.msk.msra.mxu0 %vm44_vm0, %v37_v6  ;;  %610 = vmatpush.xpose.msk.msra.mxu1 %vm44_vm0, %v37_v6 }
  0x1b   :  { %611 = vmatpush.xpose.msk.msra.mxu2 %vm44_vm0, %v37_v6  ;;  %612 = vmatpush.xpose.msk.msra.mxu3 %vm44_vm0, %v37_v6 }
  0x1e   :  { %551 = vmatpush.xpose.msk.msra.mxu0 %vm44_vm0, %v36_v7  ;;  %613 = vmatpush.xpose.msk.msra.mxu1 %vm44_vm0, %v36_v7 }
  0x1f   :  { %614 = vmatpush.xpose.msk.msra.mxu2 %vm44_vm0, %v36_v7  ;;  %615 = vmatpush.xpose.msk.msra.mxu3 %vm44_vm0, %v36_v7 }
  0x22   :  { %552 = vmatpush.xpose.msk.msra.mxu0 %vm44_vm0, %v35_v8  ;;  %616 = vmatpush.xpose.msk.msra.mxu1 %vm44_vm0, %v35_v8 }
  0x23   :  { %617 = vmatpush.xpose.msk.msra.mxu2 %vm44_vm0, %v35_v8  ;;  %618 = vmatpush.xpose.msk.msra.mxu3 %vm44_vm0, %v35_v8 }
  0x26   :  { %553 = vmatpush.xpose.msk.msra.mxu0 %vm44_vm0, %v34_v9  ;;  %619 = vmatpush.xpose.msk.msra.mxu1 %vm44_vm0, %v34_v9 }
  0x27   :  { %620 = vmatpush.xpose.msk.msra.mxu2 %vm44_vm0, %v34_v9  ;;  %621 = vmatpush.xpose.msk.msra.mxu3 %vm44_vm0, %v34_v9 }
  0x2a   :  { %554 = vmatpush.xpose.msk.msra.mxu0 %vm44_vm0, %v33_v10  ;;  %622 = vmatpush.xpose.msk.msra.mxu1 %vm44_vm0, %v33_v10 }
  0x2b   :  { %623 = vmatpush.xpose.msk.msra.mxu2 %vm44_vm0, %v33_v10  ;;  %624 = vmatpush.xpose.msk.msra.mxu3 %vm44_vm0, %v33_v10 }
  0x2e   :  { %555 = vmatpush.xpose.msk.msra.mxu0 %vm44_vm0, %v32_v11  ;;  %625 = vmatpush.xpose.msk.msra.mxu1 %vm44_vm0, %v32_v11 }
  0x2f   :  { %626 = vmatpush.xpose.msk.msra.mxu2 %vm44_vm0, %v32_v11  ;;  %627 = vmatpush.xpose.msk.msra.mxu3 %vm44_vm0, %v32_v11 }
  0x32   :  { %556 = vmatpush.xpose.msk.msra.mxu0 %vm44_vm0, %v31_v12  ;;  %628 = vmatpush.xpose.msk.msra.mxu1 %vm44_vm0, %v31_v12 }
  0x33   :  { %629 = vmatpush.xpose.msk.msra.mxu2 %vm44_vm0, %v31_v12  ;;  %630 = vmatpush.xpose.msk.msra.mxu3 %vm44_vm0, %v31_v12 }
  0x36   :  { %557 = vmatpush.xpose.msk.msra.mxu0 %vm44_vm0, %v30_v13  ;;  %631 = vmatpush.xpose.msk.msra.mxu1 %vm44_vm0, %v30_v13 }
  0x37   :  { %632 = vmatpush.xpose.msk.msra.mxu2 %vm44_vm0, %v30_v13  ;;  %633 = vmatpush.xpose.msk.msra.mxu3 %vm44_vm0, %v30_v13 }
  0x3a   :  { %558 = vmatpush.xpose.msk.msra.mxu0 %vm44_vm0, %v29_v14  ;;  %634 = vmatpush.xpose.msk.msra.mxu1 %vm44_vm0, %v29_v14 }
  0x3b   :  { %635 = vmatpush.xpose.msk.msra.mxu2 %vm44_vm0, %v29_v14  ;;  %636 = vmatpush.xpose.msk.msra.mxu3 %vm44_vm0, %v29_v14 }
  0x3e   :  { %559 = vmatpush.xpose.msk.msra.mxu0 %vm44_vm0, %v28_v15  ;;  %637 = vmatpush.xpose.msk.msra.mxu1 %vm44_vm0, %v28_v15 }
  0x3f   :  { %638 = vmatpush.xpose.msk.msra.mxu2 %vm44_vm0, %v28_v15  ;;  %639 = vmatpush.xpose.msk.msra.mxu3 %vm44_vm0, %v28_v15 }
  0x41   :  { %560 = vmatmul.msk.f32.vlgmr.msra.gmra.mxu0 %vm44_vm0, %v12_v16  ;;  %564 = vmatmul.msk.f32.vlgmr.msra.gmra.mxu1 %vm44_vm0, %v16_v17 }
  0x42   :  { %568 = vmatmul.msk.f32.vlgmr.msra.gmra.mxu2 %vm44_vm0, %v20_v18  ;;  %572 = vmatmul.msk.f32.vlgmr.msra.gmra.mxu3 %vm44_vm0, %v24_v19 }
  0x49   :  { %561 = vmatmul.msk.f32.gmra.mxu0 %vm44_vm0, %v13_v20  ;;  %565 = vmatmul.msk.f32.gmra.mxu1 %vm44_vm0, %v17_v21 }
  0x4a   :  { %569 = vmatmul.msk.f32.gmra.mxu2 %vm44_vm0, %v21_v22  ;;  %573 = vmatmul.msk.f32.gmra.mxu3 %vm44_vm0, %v25_v23 }
  0x51   :  { %562 = vmatmul.msk.f32.gmra.mxu0 %vm44_vm0, %v14_v24  ;;  %566 = vmatmul.msk.f32.gmra.mxu1 %vm44_vm0, %v18_v25 }
  0x52   :  { %570 = vmatmul.msk.f32.gmra.mxu2 %vm44_vm0, %v22_v26  ;;  %574 = vmatmul.msk.f32.gmra.mxu3 %vm44_vm0, %v26_v27 }
  0x59   :  { %563 = vmatmul.msk.f32.gmra.mxu0 %vm44_vm0, %v15_v28  ;;  %567 = vmatmul.msk.f32.gmra.mxu1 %vm44_vm0, %v19_v29 }
  0x5a   :  { %571 = vmatmul.msk.f32.gmra.mxu2 %vm44_vm0, %v23_v30  ;;  %575 = vmatmul.msk.f32.gmra.mxu3 %vm44_vm0, %v27_v31 }
  0xbe   :  { %v158_v32 = vpop.f32.mrf.mxu0  ;;  %v170_v33 = vpop.f32.mrf.mxu1 }
  0xbf   :  { %v576_v34 = vmul.f32 -1.442695, %v158_v32  ;;  %v580_v35 = vmul.f32 -1.442695, %v170_v33 }
  0xc1   :  { %643 = vpow2.f32 %v576_v34 }
  0xc2   :  { %645 = vpow2.f32 %v580_v35 }
  0xc5   :  { %v182_v36 = vpop.f32.mrf.mxu2  ;;  %v194_v37 = vpop.f32.mrf.mxu3 }
  0xc6   :  { %v584_v38 = vmul.f32 -1.442695, %v182_v36  ;;  %v588_v39 = vmul.f32 -1.442695, %v194_v37  ;;  %v161_v40 = vpop.f32.mrf.mxu0  ;;  %v173_v41 = vpop.f32.mrf.mxu1 }
  0xc7   :  { %v644_v42 = vpop.eup %643  ;;  %v577_v45 = vmul.f32 -1.442695, %v161_v40  ;;  %v581_v47 = vmul.f32 -1.442695, %v173_v41 }
  0xc8   :  { %v646_v43 = vpop.eup %645  ;;  %v254_v44 = vadd.f32 1.0, %v644_v42  ;;  %647 = vpow2.f32 %v584_v38 }
  0xc9   :  { %v258_v46 = vadd.f32 1.0, %v646_v43  ;;  %649 = vpow2.f32 %v588_v39 }
  0xca   :  { %651 = vrcp.f32 %v254_v44  ;;  %v279_v55 = vand.u32 2147483647, %v254_v44  ;;  %v281_v56 = vand.u32 2147483648, %v254_v44  ;;  %vm275_vm1 = vweird.f32 %v254_v44 }
  0xcb   :  { %653 = vrcp.f32 %v258_v46  ;;  %v339_v57 = vand.u32 2147483647, %v258_v46  ;;  %v341_v63 = vand.u32 2147483648, %v258_v46  ;;  %vm335_vm2 = vweird.f32 %v258_v46 }
  0xcc   :  { %655 = vpow2.f32 %v577_v45  ;;  %vm933_vm3 = vcmp.eq.f32.partialorder %v279_v55, 8.507059e+37  ;;  %v282_v4 = vor.u32 1.1754944e-38, %v281_v56 }
  0xcd   :  { %657 = vpow2.f32 %v581_v47  ;;  %v185_v48 = vpop.f32.mrf.mxu2  ;;  %v197_v53 = vpop.f32.mrf.mxu3  ;;  %vm937_vm4 = vcmp.eq.f32.partialorder %v339_v57, 8.507059e+37  ;;  %v342_v13 = vor.u32 1.1754944e-38, %v341_v63 }
  0xce   :  { %v648_v49 = vpop.eup %647  ;;  %v585_v50 = vmul.f32 -1.442695, %v185_v48  ;;  %v589_v0 = vmul.f32 -1.442695, %v197_v53  ;;  %v164_v7 = vpop.f32.mrf.mxu0 }
  0xcf   :  { %v650_v51 = vpop.eup %649  ;;  %v927_v52 = vadd.f32 1.0, %v648_v49  ;;  %v176_v11 = vpop.f32.mrf.mxu1  ;;  %v578_v17 = vmul.f32 -1.442695, %v164_v7 }
  0xd0   :  { %v652_v54 = vpop.eup %651  ;;  %v929_v58 = vadd.f32 1.0, %v650_v51  ;;  %v950_v21 = vmul.f32 -1.442695, %v176_v11 }
  0xd1   :  { %v654_v59 = vpop.eup %653  ;;  %v271_v60 = vmul.f32 %v652_v54, %v254_v44  ;;  %659 = vrcp.f32 %v927_v52  ;;  %vm276_vm5 = vweird.f32 %v652_v54  ;;  %v399_v16 = vand.u32 2147483647, %v927_v52 }
  0xd2   :  { %v656_v61 = vpop.eup %655  ;;  %v331_v62 = vmul.f32 %v654_v59, %v258_v46  ;;  %661 = vpow2.f32 %v585_v50  ;;  %vm336_vm6 = vweird.f32 %v654_v59  ;;  %vm277_vm7 = vmor %vm275_vm1, %vm276_vm5  ;;  %vm395_vm8 = vweird.f32 %v927_v52 }
  0xd3   :  { %v658_v1 = vpop.eup %657  ;;  %v272_v2 = vsub.f32 1.0, %v271_v60  ;;  %663 = vrcp.f32 %v929_v58  ;;  %v941_v9 = vadd.f32 1.0, %v656_v61  ;;  %vm337_vm9 = vmor %vm335_vm2, %vm336_vm6  ;;  %v401_v24 = vand.u32 2147483648, %v927_v52 }
  0xd4   :  { %v332_v5 = vsub.f32 1.0, %v331_v62  ;;  %v943_v10 = vadd.f32 1.0, %v658_v1  ;;  %665 = vpow2.f32 %v589_v0  ;;  %v459_v25 = vand.u32 2147483647, %v929_v58 }
  0xd5   :  { %v273_v8 = vmul.f32 %v652_v54, %v272_v2  ;;  %667 = vrcp.f32 %v941_v9  ;;  %vm962_vm10 = vcmp.eq.f32.partialorder %v399_v16, 8.507059e+37  ;;  %vm455_vm11 = vweird.f32 %v929_v58  ;;  %v188_v44 = vpop.f32.mrf.mxu2  ;;  %v200_v62 = vpop.f32.mrf.mxu3 }
  0xd6   :  { %v333_v12 = vmul.f32 %v654_v59, %v332_v5  ;;  %669 = vrcp.f32 %v943_v10  ;;  %v461_v32 = vand.u32 2147483648, %v929_v58  ;;  %v402_v38 = vor.u32 1.1754944e-38, %v401_v24  ;;  %v167_v5 = vpop.f32.mrf.mxu0 }
  0xd7   :  { %v660_v14 = vpop.eup %659  ;;  %v274_v15 = vadd.f32 %v652_v54, %v273_v8  ;;  %vm970_vm14 = vcmp.eq.f32.partialorder %v459_v25, 8.507059e+37  ;;  %671 = vpow2.f32 %v578_v17  ;;  %vm290_vm0 = vweird.f32 %v941_v9 }
  0xd8   :  { %v662_v18 = vpop.eup %661  ;;  %v334_v19 = vadd.f32 %v654_v59, %v333_v12  ;;  %v391_v20 = vmul.f32 %v660_v14, %v927_v52  ;;  %vm396_vm12 = vweird.f32 %v660_v14  ;;  %v462_v46 = vor.u32 1.1754944e-38, %v461_v32  ;;  %v179_v12 = vpop.f32.mrf.mxu1 }
  0xd9   :  { %v664_v22 = vpop.eup %663  ;;  %v278_v23 = vsel %vm277_vm7, %v652_v54, %v274_v15  ;;  %v968_v36 = vadd.f32 1.0, %v662_v18  ;;  %vm397_vm15 = vmor %vm395_vm8, %vm396_vm12  ;;  %v294_v47 = vand.u32 2147483647, %v941_v9  ;;  %v296_v52 = vand.u32 2147483648, %v941_v9 }
  0xda   :  { %v283_v26 = vsel %vm933_vm3, %v282_v4, %v278_v23  ;;  %v338_v27 = vsel %vm337_vm9, %v654_v59, %v334_v19  ;;  %v392_v28 = vsub.f32 1.0, %v391_v20  ;;  %v451_v29 = vmul.f32 %v664_v22, %v929_v58  ;;  %v666_v33 = vpop.eup %665 }
  0xdb   :  { %510 = vst [vmem:[#allocation2] sm:$0xff] %v283_v26  ;;  %v343_v30 = vsel %vm937_vm4, %v342_v13, %v338_v27  ;;  %v668_v37 = vpop.eup %667  ;;  %vm456_vm13 = vweird.f32 %v664_v22  ;;  %v975_v43 = vadd.f32 1.0, %v666_v33  ;;  %673 = vrcp.f32 %v968_v36 }
  0xdc   :  { %514 = vst [vmem:[#allocation2 + $0x20] sm:$0xff] %v343_v30  ;;  %v393_v34 = vmul.f32 %v660_v14, %v392_v28  ;;  %v452_v35 = vsub.f32 1.0, %v451_v29  ;;  %v286_v42 = vmul.f32 %v668_v37, %v941_v9  ;;  %v670_v45 = vpop.eup %669  ;;  %vm457_vm1 = vmor %vm455_vm11, %vm456_vm13  ;;  %vm291_vm2 = vweird.f32 %v668_v37 }
  0xdd   :  { %v346_v51 = vmul.f32 %v670_v45, %v943_v10  ;;  %v354_v54 = vand.u32 2147483647, %v943_v10  ;;  %675 = vrcp.f32 %v975_v43  ;;  %v672_v59 = vpop.eup %671  ;;  %vm350_vm3 = vweird.f32 %v943_v10  ;;  %vm292_vm5 = vmor %vm290_vm0, %vm291_vm2  ;;  %v191_v20 = vpop.f32.mrf.mxu2 }
  0xde   :  { %v394_v40 = vadd.f32 %v660_v14, %v393_v34  ;;  %v453_v41 = vmul.f32 %v664_v22, %v452_v35  ;;  %v287_v50 = vsub.f32 1.0, %v286_v42  ;;  %v356_v58 = vand.u32 2147483648, %v943_v10 }
  0xdf   :  { %v347_v57 = vsub.f32 1.0, %v346_v51  ;;  %v586_v61 = vmul.f32 -1.442695, %v188_v44  ;;  %vm351_vm4 = vweird.f32 %v670_v45  ;;  %v995_v1 = vadd.f32 1.0, %v672_v59 }
  0xe0   :  { %v398_v48 = vsel %vm397_vm15, %v660_v14, %v394_v40  ;;  %v454_v49 = vadd.f32 %v664_v22, %v453_v41  ;;  %v288_v56 = vmul.f32 %v668_v37, %v287_v50  ;;  %vm295_vm6 = vcmp.eq.f32.partialorder %v294_v47, 8.507059e+37  ;;  %vm352_vm8 = vmor %vm350_vm3, %vm351_vm4 }
  0xe1   :  { %v403_v53 = vsel %vm962_vm10, %v402_v38, %v398_v48  ;;  %v348_v0 = vmul.f32 %v670_v45, %v347_v57  ;;  %v674_v2 = vpop.eup %673  ;;  %v297_v3 = vor.u32 1.1754944e-38, %v296_v52  ;;  %vm1000_vm7 = vcmp.eq.f32.partialorder %v354_v54, 8.507059e+37 }
  0xe2   :  { %518 = vst [vmem:[#allocation2 + $0x40] sm:$0xff] %v403_v53  ;;  %v458_v55 = vsel %vm457_vm1, %v664_v22, %v454_v49  ;;  %v289_v63 = vadd.f32 %v668_v37, %v288_v56  ;;  %677 = vpow2.f32 %v950_v21  ;;  %v406_v8 = vmul.f32 %v674_v2, %v968_v36 }
  0xe3   :  { %v463_v60 = vsel %vm970_vm14, %v462_v46, %v458_v55  ;;  %v349_v7 = vadd.f32 %v670_v45, %v348_v0  ;;  %v590_v11 = vmul.f32 -1.442695, %v200_v62  ;;  %v357_v9 = vor.u32 1.1754944e-38, %v356_v58  ;;  %v676_v15 = vpop.eup %675 }
  0xe4   :  { %522 = vst [vmem:[#allocation2 + $0x60] sm:$0xff] %v463_v60  ;;  %v293_v6 = vsel %vm292_vm5, %v668_v37, %v289_v63  ;;  %v414_v14 = vand.u32 2147483647, %v968_v36  ;;  %679 = vrcp.f32 %v995_v1  ;;  %v407_v17 = vsub.f32 1.0, %v406_v8 }
  0xe5   :  { %v298_v13 = vsel %vm295_vm6, %v297_v3, %v293_v6  ;;  %v353_v16 = vsel %vm352_vm8, %v670_v45, %v349_v7  ;;  %v416_v18 = vand.u32 2147483648, %v968_v36  ;;  %v579_v19 = vmul.f32 -1.442695, %v167_v5 }
  0xe6   :  { %511 = vst [vmem:[#allocation2 + $0x8] sm:$0xff] %v298_v13  ;;  %v358_v21 = vsel %vm1000_vm7, %v357_v9, %v353_v16  ;;  %v466_v22 = vmul.f32 %v676_v15, %v975_v43  ;;  %681 = vpow2.f32 %v586_v61  ;;  %v583_v10 = vmul.f32 -1.442695, %v179_v12 }
  0xe7   :  { %515 = vst [vmem:[#allocation2 + $0x28] sm:$0xff] %v358_v21  ;;  %v408_v23 = vmul.f32 %v674_v2, %v407_v17  ;;  %vm410_vm9 = vweird.f32 %v968_v36  ;;  %vm411_vm10 = vweird.f32 %v674_v2  ;;  %683 = vpow2.f32 %v590_v11 }
  0xe8   :  { %v678_v24 = vpop.eup %677  ;;  %vm1016_vm11 = vcmp.eq.f32.partialorder %v414_v14, 8.507059e+37  ;;  %v467_v26 = vsub.f32 1.0, %v466_v22  ;;  %v474_v27 = vand.u32 2147483647, %v975_v43  ;;  %v587_v28 = vmul.f32 -1.442695, %v191_v20  ;;  %vm412_vm12 = vmor %vm410_vm9, %vm411_vm10 }
  0xe9   :  { %v409_v29 = vadd.f32 %v674_v2, %v408_v23  ;;  %v476_v30 = vand.u32 2147483648, %v975_v43  ;;  %v1022_v31 = vadd.f32 1.0, %v678_v24  ;;  %685 = vpow2.f32 %v579_v19 }
  0xea   :  { %v680_v32 = vpop.eup %679  ;;  %v417_v33 = vor.u32 1.1754944e-38, %v416_v18  ;;  %v468_v34 = vmul.f32 %v676_v15, %v467_v26  ;;  %vm471_vm13 = vweird.f32 %v676_v15  ;;  %687 = vpow2.f32 %v583_v10 }
  0xeb   :  { %v413_v35 = vsel %vm412_vm12, %v674_v2, %v409_v29  ;;  %vm470_vm14 = vweird.f32 %v975_v43  ;;  %v301_v36 = vmul.f32 %v680_v32, %v995_v1  ;;  %689 = vrcp.f32 %v1022_v31  ;;  %v203_v43 = vpop.f32.mrf.mxu3 }
  0xec   :  { %v682_v37 = vpop.eup %681  ;;  %v418_v38 = vsel %vm1016_vm11, %v417_v33, %v413_v35  ;;  %v469_v39 = vadd.f32 %v676_v15, %v468_v34  ;;  %vm475_vm15 = vcmp.eq.f32.partialorder %v474_v27, 8.507059e+37  ;;  %691 = vpow2.f32 %v587_v28  ;;  %vm472_vm0 = vmor %vm470_vm14, %vm471_vm13 }
  0xed   :  { %v684_v40 = vpop.eup %683  ;;  %519 = vst [vmem:[#allocation2 + $0x48] sm:$0xff] %v418_v38  ;;  %v477_v41 = vor.u32 1.1754944e-38, %v476_v30  ;;  %v302_v42 = vsub.f32 1.0, %v301_v36  ;;  %vm305_vm1 = vweird.f32 %v995_v1  ;;  %v1030_v44 = vadd.f32 1.0, %v682_v37 }
  0xee   :  { %v473_v45 = vsel %vm472_vm0, %v676_v15, %v469_v39  ;;  %v309_v46 = vand.u32 2147483647, %v995_v1  ;;  %v311_v47 = vand.u32 2147483648, %v995_v1  ;;  %v1034_v48 = vadd.f32 1.0, %v684_v40 }
  0xef   :  { %v686_v49 = vpop.eup %685  ;;  %v478_v50 = vsel %vm475_vm15, %v477_v41, %v473_v45  ;;  %v303_v51 = vmul.f32 %v680_v32, %v302_v42  ;;  %vm306_vm2 = vweird.f32 %v680_v32  ;;  %693 = vrcp.f32 %v1030_v44 }
  0xf0   :  { %v688_v53 = vpop.eup %687  ;;  %523 = vst [vmem:[#allocation2 + $0x68] sm:$0xff] %v478_v50  ;;  %695 = vrcp.f32 %v1034_v48  ;;  %v591_v52 = vmul.f32 -1.442695, %v203_v43  ;;  %vm307_vm3 = vmor %vm305_vm1, %vm306_vm2  ;;  %vm310_vm4 = vcmp.eq.f32.partialorder %v309_v46, 8.507059e+37  ;;  %v312_v57 = vor.u32 1.1754944e-38, %v311_v47 }
  0xf1   :  { %v690_v54 = vpop.eup %689  ;;  %v304_v55 = vadd.f32 %v680_v32, %v303_v51  ;;  %vm365_vm5 = vweird.f32 %v1022_v31  ;;  %v369_v58 = vand.u32 2147483647, %v1022_v31  ;;  %v371_v61 = vand.u32 2147483648, %v1022_v31 }
  0xf2   :  { %v692_v56 = vpop.eup %691  ;;  %v361_v59 = vmul.f32 %v690_v54, %v1022_v31  ;;  %v1044_v62 = vadd.f32 1.0, %v686_v49  ;;  %v1046_v2 = vadd.f32 1.0, %v688_v53  ;;  %697 = vpow2.f32 %v591_v52 }
  0xf3   :  { %v308_v60 = vsel %vm307_vm3, %v680_v32, %v304_v55  ;;  %v429_v3 = vand.u32 2147483647, %v1030_v44  ;;  %v431_v4 = vand.u32 2147483648, %v1030_v44  ;;  %v1051_v5 = vadd.f32 1.0, %v692_v56 }
  0xf4   :  { %v313_v63 = vsel %vm310_vm4, %v312_v57, %v308_v60  ;;  %v362_v0 = vsub.f32 1.0, %v361_v59  ;;  %699 = vrcp.f32 %v1044_v62  ;;  %vm366_vm6 = vweird.f32 %v690_v54 }
  0xf5   :  { %v694_v1 = vpop.eup %693  ;;  %512 = vst [vmem:[#allocation2 + $0x10] sm:$0xff] %v313_v63  ;;  %701 = vrcp.f32 %v1046_v2  ;;  %vm1055_vm7 = vcmp.eq.f32.partialorder %v369_v58, 8.507059e+37  ;;  %v372_v12 = vor.u32 1.1754944e-38, %v371_v61  ;;  %v489_v9 = vand.u32 2147483647, %v1034_v48  ;;  %vm367_vm9 = vmor %vm365_vm5, %vm366_vm6 }
  0xf6   :  { %v696_v6 = vpop.eup %695  ;;  %v363_v7 = vmul.f32 %v690_v54, %v362_v0  ;;  %v421_v8 = vmul.f32 %v694_v1, %v1030_v44  ;;  %vm425_vm8 = vweird.f32 %v1030_v44  ;;  %v491_v16 = vand.u32 2147483648, %v1034_v48 }
  0xf7   :  { %v481_v13 = vmul.f32 %v696_v6, %v1034_v48  ;;  %vm1065_vm10 = vcmp.eq.f32.partialorder %v429_v3, 8.507059e+37  ;;  %vm485_vm11 = vweird.f32 %v1034_v48  ;;  %703 = vrcp.f32 %v1051_v5 }
  0xf8   :  { %v364_v14 = vadd.f32 %v690_v54, %v363_v7  ;;  %v422_v15 = vsub.f32 1.0, %v421_v8  ;;  %v698_v19 = vpop.eup %697  ;;  %vm426_vm12 = vweird.f32 %v694_v1  ;;  %v432_v22 = vor.u32 1.1754944e-38, %v431_v4 }
  0xf9   :  { %v482_v18 = vsub.f32 1.0, %v481_v13  ;;  %vm486_vm13 = vweird.f32 %v696_v6  ;;  %vm1073_vm14 = vcmp.eq.f32.partialorder %v489_v9, 8.507059e+37  ;;  %v492_v28 = vor.u32 1.1754944e-38, %v491_v16  ;;  %vm427_vm0 = vmor %vm425_vm8, %vm426_vm12 }
  0xfa   :  { %v368_v20 = vsel %vm367_vm9, %v690_v54, %v364_v14  ;;  %v423_v21 = vmul.f32 %v694_v1, %v422_v15  ;;  %v700_v10 = vpop.eup %699  ;;  %vm320_vm15 = vweird.f32 %v1044_v62  ;;  %v324_v31 = vand.u32 2147483647, %v1044_v62  ;;  %vm487_vm1 = vmor %vm485_vm11, %vm486_vm13 }
  0xfb   :  { %v373_v23 = vsel %vm1055_vm7, %v372_v12, %v368_v20  ;;  %v483_v24 = vmul.f32 %v696_v6, %v482_v18  ;;  %v702_v26 = vpop.eup %701  ;;  %v316_v29 = vmul.f32 %v700_v10, %v1044_v62  ;;  %v326_v32 = vand.u32 2147483648, %v1044_v62 }
  0xfc   :  { %516 = vst [vmem:[#allocation2 + $0x30] sm:$0xff] %v373_v23  ;;  %v424_v27 = vadd.f32 %v694_v1, %v423_v21  ;;  %v376_v33 = vmul.f32 %v702_v26, %v1046_v2  ;;  %vm380_vm2 = vweird.f32 %v1046_v2  ;;  %v269_v36 = vadd.f32 1.0, %v698_v19 }
  0xfd   :  { %v484_v30 = vadd.f32 %v696_v6, %v483_v24  ;;  %v317_v35 = vsub.f32 1.0, %v316_v29  ;;  %v704_v37 = vpop.eup %703  ;;  %v386_v41 = vand.u32 2147483648, %v1046_v2  ;;  %vm321_vm3 = vweird.f32 %v700_v10 }
  0xfe   :  { %v428_v34 = vsel %vm427_vm0, %v694_v1, %v424_v27  ;;  %v377_v40 = vsub.f32 1.0, %v376_v33  ;;  %v436_v43 = vmul.f32 %v704_v37, %v1051_v5  ;;  %vm381_vm4 = vweird.f32 %v702_v26  ;;  %vm322_vm6 = vmor %vm320_vm15, %vm321_vm3 }
  0xff   :  { %v433_v38 = vsel %vm1065_vm10, %v432_v22, %v428_v34  ;;  %v488_v39 = vsel %vm487_vm1, %v696_v6, %v484_v30  ;;  %v318_v44 = vmul.f32 %v700_v10, %v317_v35  ;;  %v384_v46 = vand.u32 2147483647, %v1046_v2  ;;  %vm382_vm7 = vmor %vm380_vm2, %vm381_vm4 }
 0x100   :  { %520 = vst [vmem:[#allocation2 + $0x50] sm:$0xff] %v433_v38  ;;  %v493_v42 = vsel %vm1073_vm14, %v492_v28, %v488_v39  ;;  %v378_v45 = vmul.f32 %v702_v26, %v377_v40  ;;  %705 = vrcp.f32 %v269_v36  ;;  %vm325_vm5 = vcmp.eq.f32.partialorder %v324_v31, 8.507059e+37 }
 0x101   :  { %524 = vst [vmem:[#allocation2 + $0x70] sm:$0xff] %v493_v42  ;;  %v319_v47 = vadd.f32 %v700_v10, %v318_v44  ;;  %v437_v48 = vsub.f32 1.0, %v436_v43  ;;  %v327_v49 = vor.u32 1.1754944e-38, %v326_v32  ;;  %v444_v51 = vand.u32 2147483647, %v1051_v5 }
 0x102   :  { %v379_v50 = vadd.f32 %v702_v26, %v378_v45  ;;  %v446_v53 = vand.u32 2147483648, %v1051_v5  ;;  %v387_v54 = vor.u32 1.1754944e-38, %v386_v41  ;;  %vm441_vm8 = vweird.f32 %v704_v37 }
 0x103   :  { %v323_v52 = vsel %vm322_vm6, %v700_v10, %v319_v47  ;;  %v438_v55 = vmul.f32 %v704_v37, %v437_v48  ;;  %vm385_vm9 = vcmp.eq.f32.partialorder %v384_v46, 8.507059e+37  ;;  %vm440_vm10 = vweird.f32 %v1051_v5 }
 0x104   :  { %v328_v56 = vsel %vm325_vm5, %v327_v49, %v323_v52  ;;  %v383_v57 = vsel %vm382_vm7, %v702_v26, %v379_v50  ;;  %vm442_vm11 = vmor %vm440_vm10, %vm441_vm8  ;;  %v447_v61 = vor.u32 1.1754944e-38, %v446_v53  ;;  %vm445_vm12 = vcmp.eq.f32.partialorder %v444_v51, 8.507059e+37 }
 0x105   :  { %513 = vst [vmem:[#allocation2 + $0x18] sm:$0xff] %v328_v56  ;;  %v388_v59 = vsel %vm385_vm9, %v387_v54, %v383_v57  ;;  %v439_v60 = vadd.f32 %v704_v37, %v438_v55  ;;  %v506_v1 = vand.u32 2147483648, %v269_v36  ;;  %v504_v4 = vand.u32 2147483647, %v269_v36 }
 0x106   :  { %v706_v58 = vpop.eup %705  ;;  %517 = vst [vmem:[#allocation2 + $0x38] sm:$0xff] %v388_v59  ;;  %vm500_vm14 = vweird.f32 %v269_v36 }
 0x107   :  { %v443_v62 = vsel %vm442_vm11, %v704_v37, %v439_v60  ;;  %v496_v63 = vmul.f32 %v706_v58, %v269_v36  ;;  %vm501_vm13 = vweird.f32 %v706_v58  ;;  %v507_v6 = vor.u32 1.1754944e-38, %v506_v1 }
 0x108   :  { %v448_v0 = vsel %vm445_vm12, %v447_v61, %v443_v62  ;;  %vm502_vm15 = vmor %vm500_vm14, %vm501_vm13  ;;  %vm505_vm0 = vcmp.eq.f32.partialorder %v504_v4, 8.507059e+37 }
 0x109   :  { %521 = vst [vmem:[#allocation2 + $0x58] sm:$0xff] %v448_v0  ;;  %v497_v2 = vsub.f32 1.0, %v496_v63 }
 0x10b   :  { %v498_v3 = vmul.f32 %v706_v58, %v497_v2 }
 0x10d   :  { %v499_v5 = vadd.f32 %v706_v58, %v498_v3 }
 0x10f   :  { %v503_v7 = vsel %vm502_vm15, %v706_v58, %v499_v5 }
 0x110   :  { %v508_v8 = vsel %vm505_vm0, %v507_v6, %v503_v7 }
 0x111   :  { %525 = vst [vmem:[#allocation2 + $0x78] sm:$0xff] %v508_v8 }
 0x112   :  { %538 = dma.vmem_to_hbm [thread:$0]  %s531_s16, 2048, %s533_s1, [#allocation3], %s734_s19, %s734_s19, %s735_s20  }
 0x113   :  { %731 = dma.done.wait [#allocation3], 2048  }
 0x114   :  { %732 = vsyncadd [#allocation3], 4294965248 }
 0x115   :  { %543 = vsyncpa [#allocation3], 1 }

</bundles_post_ra>
